<compile_context>
chip_gen: v5e
topology: v5e:2x2
jax: 0.10.0
libtpu: 0.0.40
codegen_flags: <defaults>
</compile_context>

<pallas_src>
import math

import jax
import jax.numpy as jnp
from jax.experimental import pallas as pl
from jax.experimental.pallas import tpu as pltpu

IN_FEATURES = 128
NUM_CLASSES = 10
LANE = 128
SUBLANE = 8


def _round_up(n, m):
    return ((n + m - 1) // m) * m


# --------------------------------------------------------------------------- #
# Kernel: one lane-dense matmul + bias for both heads.
# --------------------------------------------------------------------------- #
def _fc_head_kernel(x_ref, w_ref, b_ref, o_ref):
    # (TB, K) @ (K, 128) -> (TB, 128), f32 accumulation, f32 bias add.
    y = jnp.dot(x_ref[...], w_ref[...], preferred_element_type=jnp.float32)
    o_ref[...] = (y + b_ref[...]).astype(o_ref.dtype)


# --------------------------------------------------------------------------- #
# Parameter packing (hoist this out of the per-step / per-call path).
# --------------------------------------------------------------------------- #
def pack_cnn13_fc_params(v1, g1, b1, v2, g2, b2, dtype=jnp.float32):
    """Precompute the fused, weight-normalized, transposed, lane-padded params.

    PyTorch weight_norm parametrization (dim=0): w[j] = g[j] * v[j] / ||v[j]||_2.
    Returns:
      w_packed: (IN_FEATURES, 128) = [wn(fc1).T | wn(fc2).T | zero pad], dtype `dtype`
      b_packed: (1, 128)           = [b1 | b2 | zero pad], f32
    """
    v = jnp.concatenate([v1, v2], axis=0).astype(jnp.float32)            # (2C, K)
    g = jnp.concatenate([g1.reshape(-1, 1), g2.reshape(-1, 1)], axis=0).astype(jnp.float32)
    b = jnp.concatenate([b1.reshape(-1), b2.reshape(-1)]).astype(jnp.float32)

    norm = jnp.sqrt(jnp.sum(v * v, axis=1, keepdims=True))               # (2C, 1)
    w = (g * v / norm).T                                                 # (K, 2C)

    n_real = w.shape[1]
    w_packed = jnp.pad(w, ((0, 0), (0, LANE - n_real))).astype(dtype)    # (K, 128)
    b_packed = jnp.pad(b.reshape(1, -1), ((0, 0), (0, LANE - n_real)))   # (1, 128) f32
    return w_packed, b_packed


# --------------------------------------------------------------------------- #
# Tiling choice: minimal tail padding, grid >= 2 for megacore when B is big.
# --------------------------------------------------------------------------- #
def _choose_batch_tile(B, tile_b):
    n = pl.cdiv(B, tile_b)
    if B >= 2 * SUBLANE:
        n = max(n, 2)            # let ("parallel",) shard across both v7x TCs
    TB = _round_up(pl.cdiv(B, n), SUBLANE)
    n = pl.cdiv(B, TB)
    return TB, n


# --------------------------------------------------------------------------- #
# Apply: the hot path.  Only layout-free work in the wrapper.
# --------------------------------------------------------------------------- #
def cnn13_fc_apply(x, w_packed, b_packed, *, num_classes=NUM_CLASSES,
                   tile_b=1024, out_dtype=None):
    B, K = x.shape
    assert K == IN_FEATURES
    assert 2 * num_classes <= LANE
    out_dtype = x.dtype if out_dtype is None else out_dtype

    TB, n = _choose_batch_tile(B, tile_b)
    Bp = n * TB
    # Tail padding is at most a handful of sublanes (see _choose_batch_tile).
    x_p = x if Bp == B else jnp.pad(x, ((0, Bp - B), (0, 0)))

    itemsize_in = jnp.dtype(x.dtype).itemsize
    itemsize_out = jnp.dtype(out_dtype).itemsize
    itemsize_w = jnp.dtype(w_packed.dtype).itemsize
    cost = pl.CostEstimate(
        flops=2 * Bp * K * LANE,
        transcendentals=0,
        bytes_accessed=Bp * K * itemsize_in + Bp * LANE * itemsize_out
        + K * LANE * itemsize_w + LANE * 4,
    )

    out = pl.pallas_call(
        _fc_head_kernel,
        out_shape=jax.ShapeDtypeStruct((Bp, LANE), out_dtype),
        grid=(n,),
        in_specs=[
            pl.BlockSpec((TB, K), lambda i: (i, 0)),       # x tile (pipelined)
            pl.BlockSpec((K, LANE), lambda i: (0, 0)),     # packed weight (resident)
            pl.BlockSpec((1, LANE), lambda i: (0, 0)),     # packed bias   (resident)
        ],
        out_specs=pl.BlockSpec((TB, LANE), lambda i: (i, 0)),
        compiler_params=pltpu.CompilerParams(
            dimension_semantics=("parallel",),
        ),
        cost_estimate=cost,
    )(x_p, w_packed, b_packed)

    y1 = out[:B, :num_classes]
    y2 = out[:B, num_classes:2 * num_classes]
    return y1, y2


def cnn13_fc(x, v1, g1, b1, v2, g2, b2, *, tile_b=1024, out_dtype=None):
    """Convenience wrapper = pack + apply.

    For repeated calls, hoist pack_cnn13_fc_params() out of the loop (it only
    depends on parameters); under jit with constant params it constant-folds.
    """
    w_packed, b_packed = pack_cnn13_fc_params(v1, g1, b1, v2, g2, b2, dtype=x.dtype)
    return cnn13_fc_apply(x, w_packed, b_packed, num_classes=v1.shape[0],
                          tile_b=tile_b, out_dtype=out_dtype)


if __name__ == "__main__":
    key = jax.random.PRNGKey(0)
    kx, kv1, kg1, kb1, kv2, kg2, kb2 = jax.random.split(key, 7)

    B = 8
    x = jax.random.normal(kx, (B, IN_FEATURES), jnp.float32)

    bound = 1.0 / math.sqrt(IN_FEATURES)
    v1 = jax.random.uniform(kv1, (NUM_CLASSES, IN_FEATURES), jnp.float32, -bound, bound)
    v2 = jax.random.uniform(kv2, (NUM_CLASSES, IN_FEATURES), jnp.float32, -bound, bound)
    g1 = jax.random.uniform(kg1, (NUM_CLASSES, 1), jnp.float32, 0.5, 1.5)
    g2 = jax.random.uniform(kg2, (NUM_CLASSES, 1), jnp.float32, 0.5, 1.5)
    b1 = jax.random.uniform(kb1, (NUM_CLASSES,), jnp.float32, -bound, bound)
    b2 = jax.random.uniform(kb2, (NUM_CLASSES,), jnp.float32, -bound, bound)

    # Pack once (parameter-only work, hoisted out of the per-call path).
    w_packed, b_packed = pack_cnn13_fc_params(v1, g1, b1, v2, g2, b2, dtype=x.dtype)
    y1, y2 = cnn13_fc_apply(x, w_packed, b_packed, num_classes=NUM_CLASSES)
    jax.block_until_ready((y1, y2))

    # Pure-JAX f32 reference (weight_norm with dim=0, PyTorch convention).
    def wn(v, g):
        return g * v / jnp.linalg.norm(v, axis=1, keepdims=True)

    ref1 = x @ wn(v1, g1).T + b1
    ref2 = x @ wn(v2, g2).T + b2

    assert y1.shape == (B, NUM_CLASSES) and y2.shape == (B, NUM_CLASSES)
    # f32 storage + f32 accumulation; tolerance covers the TPU MXU's default
    # reduced-precision f32 matmul path.
    assert jnp.allclose(y1, ref1, atol=2e-2, rtol=2e-2)
    assert jnp.allclose(y2, ref2, atol=2e-2, rtol=2e-2)

    print("KERNEL_OK")
</pallas_src>

<mosaic_0001>
module attributes {stable_mosaic.version = 11 : i64} {
  func.func @_fc_head_kernel(%arg0: i32, %arg1: memref<8x128xf32, #tpu.memory_space<vmem>>, %arg2: memref<128x128xf32, #tpu.memory_space<vmem>>, %arg3: memref<1x128xf32, #tpu.memory_space<vmem>>, %arg4: memref<8x128xf32, #tpu.memory_space<vmem>>) attributes {dimension_semantics = [#tpu.dimension_semantics<parallel>], iteration_bounds = array<i64: 1>, scalar_prefetch = 0 : i64, scratch_operands = 0 : i64, tpu.core_type = #tpu.core_type<tc>, window_params = [{transform_indices = @transform_0, window_bounds = array<i64: 8, 128>}, {pipeline_mode = #tpu.pipeline_mode<synchronous>, transform_indices = @transform_1, window_bounds = array<i64: 128, 128>}, {pipeline_mode = #tpu.pipeline_mode<synchronous>, transform_indices = @transform_2, window_bounds = array<i64: 1, 128>}, {transform_indices = @transform_3, window_bounds = array<i64: 8, 128>}]} {
    %c0 = arith.constant 0 : index
    %c0_0 = arith.constant 0 : index
    %0 = vector.load %arg1[%c0, %c0_0] : memref<8x128xf32, #tpu.memory_space<vmem>>, vector<8x128xf32>
    %c0_1 = arith.constant 0 : index
    %c0_2 = arith.constant 0 : index
    %1 = vector.load %arg2[%c0_1, %c0_2] : memref<128x128xf32, #tpu.memory_space<vmem>>, vector<128x128xf32>
    %cst = arith.constant dense<0.000000e+00> : vector<8x128xf32>
    %2 = tpu.matmul %0, %1, %cst {dimension_numbers = #tpu.dot_dimension_numbers<[1], [0], [0], [1], [0, 0, 1, 1], [], []>} : vector<8x128xf32>, vector<128x128xf32>, vector<8x128xf32> -> vector<8x128xf32>
    %c0_3 = arith.constant 0 : index
    %c0_4 = arith.constant 0 : index
    %3 = vector.load %arg3[%c0_3, %c0_4] : memref<1x128xf32, #tpu.memory_space<vmem>>, vector<1x128xf32>
    %4 = vector.broadcast %3 : vector<1x128xf32> to vector<8x128xf32>
    %5 = arith.addf %2, %4 : vector<8x128xf32>
    %c0_5 = arith.constant 0 : index
    %c0_6 = arith.constant 0 : index
    %6 = vector.load %arg4[%c0_5, %c0_6] : memref<8x128xf32, #tpu.memory_space<vmem>>, vector<8x128xf32>
    tpu.vector_store %arg4[%c0_5, %c0_6], %5 {strides = array<i32>} : memref<8x128xf32, #tpu.memory_space<vmem>>, vector<8x128xf32>,
    return
  }
  func.func @transform_0(%arg0: i32) -> (i32, i32) {
    %c0_i32 = arith.constant 0 : i32
    %c0_i32_0 = arith.constant 0 : i32
    return %arg0, %c0_i32 : i32, i32
  }
  func.func @transform_1(%arg0: i32) -> (i32, i32) {
    %c0_i32 = arith.constant 0 : i32
    %c0_i32_0 = arith.constant 0 : i32
    %c0_i32_1 = arith.constant 0 : i32
    return %c0_i32, %c0_i32_0 : i32, i32
  }
  func.func @transform_2(%arg0: i32) -> (i32, i32) {
    %c0_i32 = arith.constant 0 : i32
    %c0_i32_0 = arith.constant 0 : i32
    %c0_i32_1 = arith.constant 0 : i32
    return %c0_i32, %c0_i32_0 : i32, i32
  }
  func.func @transform_3(%arg0: i32) -> (i32, i32) {
    %c0_i32 = arith.constant 0 : i32
    %c0_i32_0 = arith.constant 0 : i32
    return %arg0, %c0_i32 : i32, i32
  }
}

</mosaic_0001>

<bundles_post_ra>
// kernel: tpu_custom_call.1
= control target key start
LH: loop header
LB: loop body
LE: loop exit
PB: predicated region body
PF: predicated region fallthrough
CT: control target
= control target key end

     0   :  { %8 = vsyncpa [#allocation3], 0  ;;  %s226_s0 = inlined_call_operand.hbm [shape: f32[8,128], index: 0, kind: input, shape index: {}]   ;;  %s227_s1 = inlined_call_operand.hbm [shape: f32[128,128], index: 1, kind: input, shape index: {}]   ;;  %s228_s2 = inlined_call_operand.vmem [shape: f32[1,128], index: 2, kind: input, shape index: {}]   ;;  %s229_s3 = inlined_call_operand.hbm [shape: f32[8,128], index: 3, kind: output, shape index: {}]  }
   0x1   :  { %9 = vsyncpa [#allocation6], 0 }
   0x2   :  { %10 = vsyncpa [#allocation4], 0  ;;  %s16_s14 = sshll.u32 %s226_s0, 4  ;;  %s189_s15 = smov [#allocation2]   ;;  %s17_s14 = int_to_ptr.hbm [resolvable:$true] %s16_s14 }
   0x3   :  { %s18_s16 = sshll.u32 %s189_s15, 4  ;;  %s26_s19 = sshll.u32 %s227_s1, 4  ;;  %s19_s16 = int_to_ptr.vmem [resolvable:$true] %s18_s16  ;;  %s27_s19 = int_to_ptr.hbm [resolvable:$true] %s26_s19 }
   0x4   :  { %21 = dma.hbm_to_vmem [thread:$0]  %s17_s14, 128, %s19_s16, [#allocation3]  }
   0x5   :  { %s190_s20 = smov [#allocation5]   ;;  %s191_s22 = smov 128  }
   0x6   :  { %s28_s21 = sshll.u32 %s190_s20, 4  ;;  %s192_s23 = smov 8   ;;  %s29_s21 = int_to_ptr.vmem [resolvable:$true] %s28_s21 }
   0x7   :  { %34 = dma.hbm_to_vmem [thread:$0]  %s27_s19, 2048, %s29_s21, [#allocation6], %s191_s22, %s191_s22, %s192_s23  }
   0x8   :  { %183 = dma.done.wait [#allocation3], 128  }
   0x9   :  { %184 = vsyncadd [#allocation3], 4294967168 }
   0xa   :  { %185 = dma.done.wait [#allocation6], 2048  }
   0xb   :  { %186 = vsyncadd [#allocation6], 4294965248  ;;  %v61_v0 = vld [vmem:[#allocation5 + $0x78] sm:$0xff]  ;;  %v60_v1 = vld [vmem:[#allocation5 + $0x70] sm:$0xff]  ;;  %s193_s24 = smov [#allocation7]   ;;  %s94_s28 = sshll.u32 %s229_s3, 4  ;;  %s95_s28 = int_to_ptr.hbm [resolvable:$true] %s94_s28 }
   0xc   :  { %66 = vmatpush.msra.mxu0 %v61_v0  ;;  %v59_v2 = vld [vmem:[#allocation5 + $0x68] sm:$0xff]  ;;  %v58_v3 = vld [vmem:[#allocation5 + $0x60] sm:$0xff]  ;;  %v57_v4 = vld [vmem:[#allocation5 + $0x58] sm:$0xff]  ;;  %s92_s25 = sshll.u32 %s193_s24, 4  ;;  %s93_s25 = int_to_ptr.vmem [resolvable:$true] %s92_s25 }
   0xd   :  { %v56_v5 = vld [vmem:[#allocation5 + $0x50] sm:$0xff]  ;;  %v55_v6 = vld [vmem:[#allocation5 + $0x48] sm:$0xff]  ;;  %v54_v7 = vld [vmem:[#allocation5 + $0x40] sm:$0xff] }
   0xe   :  { %67 = vmatpush.msra.mxu0 %v60_v1  ;;  %v53_v8 = vld [vmem:[#allocation5 + $0x38] sm:$0xff]  ;;  %v52_v9 = vld [vmem:[#allocation5 + $0x30] sm:$0xff]  ;;  %v51_v10 = vld [vmem:[#allocation5 + $0x28] sm:$0xff] }
   0xf   :  { %v50_v11 = vld [vmem:[#allocation5 + $0x20] sm:$0xff]  ;;  %v49_v12 = vld [vmem:[#allocation5 + $0x18] sm:$0xff]  ;;  %v48_v13 = vld [vmem:[#allocation5 + $0x10] sm:$0xff] }
  0x10   :  { %68 = vmatpush.msra.mxu0 %v59_v2  ;;  %v47_v14 = vld [vmem:[#allocation5 + $0x8] sm:$0xff]  ;;  %v46_v15 = vld [vmem:[#allocation5] sm:$0xff]  ;;  %v45_v16 = vld [vmem:[#allocation2] sm:$0xff] }
  0x11   :  { %v110_v17 = vld [vmem:[%s228_s2] ss:$0 sm:$0xff] }
  0x12   :  { %69 = vmatpush.msra.mxu0 %v58_v3 }
  0x14   :  { %70 = vmatpush.msra.mxu0 %v57_v4 }
  0x16   :  { %71 = vmatpush.msra.mxu0 %v56_v5 }
  0x18   :  { %72 = vmatpush.msra.mxu0 %v55_v6 }
  0x1a   :  { %73 = vmatpush.msra.mxu0 %v54_v7 }
  0x1c   :  { %74 = vmatpush.msra.mxu0 %v53_v8 }
  0x1e   :  { %75 = vmatpush.msra.mxu0 %v52_v9 }
  0x20   :  { %76 = vmatpush.msra.mxu0 %v51_v10 }
  0x22   :  { %77 = vmatpush.msra.mxu0 %v50_v11 }
  0x24   :  { %78 = vmatpush.msra.mxu0 %v49_v12 }
  0x26   :  { %79 = vmatpush.msra.mxu0 %v48_v13 }
  0x28   :  { %80 = vmatpush.msra.mxu0 %v47_v14 }
  0x2a   :  { %81 = vmatpush.msra.mxu0 %v46_v15 }
  0x2b   :  { %82 = vmatmul.f32.vlgmr.msra.gmra.mxu0 %v45_v16 }
  0xa8   :  { %v83_v18 = vpop.f32.mrf.mxu0 }
  0xa9   :  { %v84_v19 = vadd.f32 %v110_v17, %v83_v18 }
  0xab   :  { %86 = vst [vmem:[#allocation7] sm:$0xff] %v84_v19 }
  0xac   :  { %97 = dma.vmem_to_hbm [thread:$0]  %s93_s25, 128, %s95_s28, [#allocation4]  }
  0xad   :  { %187 = dma.done.wait [#allocation4], 128  }
  0xae   :  { %188 = vsyncadd [#allocation4], 4294967168 }
  0xaf   :  { %102 = vsyncpa [#allocation3], 1 }
  0xb0   :  { %103 = vsyncpa [#allocation6], 1 }
  0xb1   :  { %104 = vsyncpa [#allocation4], 1 }

</bundles_post_ra>
